<compile_context>
chip_gen: v5e
topology: v5e:2x2
jax: 0.10.0
libtpu: 0.0.40
codegen_flags: <defaults>
</compile_context>

<pallas_src>
import numpy as np
import jax
import jax.numpy as jnp
from jax.experimental import pallas as pl
from jax.experimental.pallas import tpu as pltpu


def _bilinear_weight_matrix(out_size: int, in_size: int) -> np.ndarray:
    """Row-stochastic bilinear interpolation matrix (half-pixel centers)."""
    i = np.arange(out_size, dtype=np.float64)
    src = (i + 0.5) * (in_size / out_size) - 0.5
    i0 = np.floor(src)
    frac = (src - i0).astype(np.float32)
    i0c = np.clip(i0.astype(np.int64), 0, in_size - 1)
    i1c = np.clip(i0.astype(np.int64) + 1, 0, in_size - 1)
    w = np.zeros((out_size, in_size), dtype=np.float32)
    rows = np.arange(out_size)
    np.add.at(w, (rows, i0c), 1.0 - frac)
    np.add.at(w, (rows, i1c), frac)
    return w


def _resized_hw(H: int, W: int, resize_size: int):
    # torchvision F.resize with a single int: short side -> resize_size,
    # long side = int(resize_size * long / short)  (truncation, not round).
    if H <= W:
        return resize_size, int(resize_size * W / H)
    return int(resize_size * H / W), resize_size


def _make_kernel(G: int, C: int, Hp: int, crop: int, compute_dtype):
    def kernel(bias_ref, wh_ref, wwt_ref, x_ref, o_ref):
        # bias_ref: SMEM (C,)                 = mean/std
        # wh_ref:   VMEM (C, crop, Hp)        = Wh * (1/std * int_rescale), compute_dtype
        # wwt_ref:  VMEM (W, crop)            = Ww^T, compute_dtype
        # x_ref:    VMEM (G*C*Hp, W)          = raw image rows (original dtype)
        # o_ref:    VMEM (G, C, crop, crop)   float32
        wwt = wwt_ref[...]                                                    # (W, crop)
        x_all = x_ref[...].astype(compute_dtype)                              # (G*C*Hp, W)
        # One fused W-contraction for all images & channels in this block.
        cols_all = jnp.dot(x_all, wwt, preferred_element_type=jnp.float32)    # (G*C*Hp, crop)
        cols_all = cols_all.astype(compute_dtype)
        for g in range(G):
            for c in range(C):
                r = (g * C + c) * Hp                                          # 8-aligned static slice
                o_ref[g, c] = (jnp.dot(wh_ref[c], cols_all[r:r + Hp],
                                       preferred_element_type=jnp.float32)
                               - bias_ref[c])
    return kernel


def image_classification_preprocess(x,
                                    *,
                                    crop_size: int,
                                    resize_size: int = 256,
                                    mean=(0.485, 0.456, 0.406),
                                    std=(0.229, 0.224, 0.225),
                                    compute_in_bf16: bool = True):
    x = jnp.asarray(x)
    squeeze = (x.ndim == 3)
    if squeeze:
        x = x[None]
    B, C, H, W = x.shape
    assert len(mean) == C and len(std) == C

    new_h, new_w = _resized_hw(H, W, resize_size)
    if crop_size > new_h or crop_size > new_w:
        # TODO(synk): torchvision pads when crop_size > resized image; unsupported here.
        raise NotImplementedError("crop_size larger than the resized image is unsupported")

    wh_full = _bilinear_weight_matrix(new_h, H)
    ww_full = _bilinear_weight_matrix(new_w, W)

    # torchvision center_crop offsets
    top = int(round((new_h - crop_size) / 2.0))
    left = int(round((new_w - crop_size) / 2.0))
    wh = wh_full[top:top + crop_size]                    # (crop, H)
    ww = ww_full[left:left + crop_size]                  # (crop, W)

    mean_np = np.asarray(mean, np.float32)
    inv_std = (1.0 / np.asarray(std, np.float32)).astype(np.float32)

    # convert_image_dtype: integer inputs rescale to [0, 1]; float is identity.
    if jnp.issubdtype(x.dtype, jnp.integer):
        scale = np.float32(1.0 / float(jnp.iinfo(x.dtype).max))
    else:
        scale = np.float32(1.0)

    itemsize = np.dtype(x.dtype).itemsize
    compute_dtype = jnp.bfloat16 if compute_in_bf16 else jnp.float32
    cdt_size = 2 if compute_in_bf16 else 4

    # Pad H so image-row blocks are sublane aligned for the input dtype
    # (8 for 32-bit, 16 for 16-bit, 32 for 8-bit); padded rows get zero weight.
    row_align = {1: 32, 2: 16}.get(itemsize, 8)
    Hp = -(-H // row_align) * row_align
    if Hp != H:
        x = jnp.pad(x, ((0, 0), (0, 0), (0, Hp - H), (0, 0)))
        wh = np.pad(wh, ((0, 0), (0, Hp - H)))

    # Fold 1/std (and the int->float rescale) into Wh -> epilogue is one subtract.
    wh_scaled = (wh[None, :, :] * (inv_std * scale)[:, None, None]).astype(np.float32)  # (C, crop, Hp)
    wwt = np.ascontiguousarray(ww.T).astype(np.float32)                                  # (W, crop)
    bias = (mean_np * inv_std).astype(np.float32)                                        # (C,)

    # Host-side flatten (free, contiguous): guarantees the big fused lane-dense matmul.
    x2d = x.reshape(B * C * Hp, W)

    def vmem_need(g):
        img_block = g * C * Hp * W * itemsize                 # pipelined input block
        img_cast = g * C * Hp * W * cdt_size                  # in-kernel cast copy
        cols = g * C * Hp * crop_size * (4 + cdt_size)        # f32 matmul result + cast copy
        out_block = g * C * crop_size * crop_size * 4
        weights = (C * crop_size * Hp + W * crop_size) * cdt_size
        # inputs/outputs are double buffered by the pipeline; the constant-index
        # weight blocks keep the default 2 buffers as well.
        # TODO(synk): pipeline_mode=pl.Buffered(1) on the weight specs would reclaim one copy.
        return 2 * img_block + img_cast + cols + 2 * out_block + 2 * weights + (2 << 20)

    # Per-generation VMEM budget (v7x: 64 MiB/TC; v5e/v6e: 128 MiB). ~80% leaves
    # headroom for compiler scratch/spill.
    try:
        phys_vmem = int(getattr(pltpu.get_tpu_info(), "vmem_capacity_bytes", 0)) or (64 << 20)
    except Exception:
        phys_vmem = 64 << 20
    budget = int(phys_vmem * 0.8)

    if vmem_need(1) > budget:
        # TODO(synk): add an H row-chunk grid axis ("arbitrary") with a VMEM f32
        # accumulator (or manual HBM double-buffering) for images whose single-
        # image block exceeds the per-generation VMEM budget.
        raise NotImplementedError(
            f"single-image block needs ~{vmem_need(1)} B of VMEM, budget is {budget} B")

    # Images per grid step: largest divisor of B that fits VMEM; prefer >= 2
    # grid steps so both v7x TensorCores get work.  Cap keeps the unrolled
    # per-(image, channel) epilogue small.
    max_group = 16
    divisors = [d for d in range(1, B + 1) if B % d == 0 and d <= max_group]
    fitting = [d for d in divisors if vmem_need(d) <= budget]
    two_step = [d for d in fitting if B // d >= 2]
    G = max(two_step) if two_step else max(fitting)

    vmem_limit = int(min(max(vmem_need(G), 16 << 20), budget))

    kernel = _make_kernel(G, C, Hp, crop_size, compute_dtype)

    out = pl.pallas_call(
        kernel,
        out_shape=jax.ShapeDtypeStruct((B, C, crop_size, crop_size), jnp.float32),
        grid_spec=pltpu.PrefetchScalarGridSpec(
            num_scalar_prefetch=0,
            grid=(B // G,),
            in_specs=[
                pl.BlockSpec(memory_space=pltpu.MemorySpace.SMEM),            # bias (C,)
                pl.BlockSpec((C, crop_size, Hp), lambda i: (0, 0, 0)),        # Wh (scaled)
                pl.BlockSpec((W, crop_size), lambda i: (0, 0)),               # Ww^T
                pl.BlockSpec((G * C * Hp, W), lambda i: (i, 0)),              # image rows
            ],
            out_specs=pl.BlockSpec((G, C, crop_size, crop_size),
                                   lambda i: (i, 0, 0, 0)),
        ),
        compiler_params=pltpu.CompilerParams(
            dimension_semantics=("parallel",),
            vmem_limit_bytes=vmem_limit),
    )(jnp.asarray(bias),
      jnp.asarray(wh_scaled, dtype=compute_dtype),
      jnp.asarray(wwt, dtype=compute_dtype),
      x2d)
    return out[0] if squeeze else out


def _reference(x, wh, ww, mean, std):
    # pure-JAX reference with the same interpolation matrices (f32 everywhere)
    resized = jnp.einsum('oh,bchw->bcow', wh, x.astype(jnp.float32))
    resized = jnp.einsum('pw,bcow->bcop', ww, resized)
    return (resized - mean[None, :, None, None]) / std[None, :, None, None]


if __name__ == "__main__":
    key = jax.random.PRNGKey(0)
    B, C, H, W = 4, 3, 44, 48          # non-square, H not a multiple of 8 (exercises padding)
    resize_size, crop_size = 32, 24
    mean = (0.485, 0.456, 0.406)
    std = (0.229, 0.224, 0.225)

    x = jax.random.uniform(key, (B, C, H, W), dtype=jnp.float32)  # image in [0, 1]

    out_bf16 = image_classification_preprocess(
        x, crop_size=crop_size, resize_size=resize_size, mean=mean, std=std)
    out_bf16 = jax.block_until_ready(out_bf16)

    out_f32 = image_classification_preprocess(
        x, crop_size=crop_size, resize_size=resize_size, mean=mean, std=std,
        compute_in_bf16=False)
    out_f32 = jax.block_until_ready(out_f32)

    # sanity check against a plain-JAX reference using the same weight matrices
    new_h, new_w = _resized_hw(H, W, resize_size)
    wh_full = _bilinear_weight_matrix(new_h, H)
    ww_full = _bilinear_weight_matrix(new_w, W)
    top = int(round((new_h - crop_size) / 2.0))
    left = int(round((new_w - crop_size) / 2.0))
    ref = _reference(x,
                     jnp.asarray(wh_full[top:top + crop_size]),
                     jnp.asarray(ww_full[left:left + crop_size]),
                     jnp.asarray(mean, jnp.float32),
                     jnp.asarray(std, jnp.float32))
    assert out_bf16.shape == (B, C, crop_size, crop_size)
    # f32 path: tight check; bf16 MXU path: relaxed tolerance (preprocessing accuracy).
    np.testing.assert_allclose(np.asarray(out_f32), np.asarray(ref), rtol=1e-5, atol=1e-5)
    np.testing.assert_allclose(np.asarray(out_bf16), np.asarray(ref), rtol=5e-2, atol=5e-2)
    print("KERNEL_OK")
</pallas_src>

<mosaic_0001>
module attributes {stable_mosaic.version = 11 : i64} {
  func.func @kernel(%arg0: i32, %arg1: memref<3xf32, #tpu.memory_space<smem>>, %arg2: memref<3x24x48xbf16, #tpu.memory_space<vmem>>, %arg3: memref<48x24xbf16, #tpu.memory_space<vmem>>, %arg4: memref<288x48xf32, #tpu.memory_space<vmem>>, %arg5: memref<2x3x24x24xf32, #tpu.memory_space<vmem>>) attributes {dimension_semantics = [#tpu.dimension_semantics<parallel>], iteration_bounds = array<i64: 2>, scalar_prefetch = 0 : i64, scratch_operands = 0 : i64, tpu.core_type = #tpu.core_type<tc>, window_params = [{transform_indices = @transform_0, window_bounds = array<i64: 3>}, {pipeline_mode = #tpu.pipeline_mode<synchronous>, transform_indices = @transform_1, window_bounds = array<i64: 3, 24, 48>}, {pipeline_mode = #tpu.pipeline_mode<synchronous>, transform_indices = @transform_2, window_bounds = array<i64: 48, 24>}, {transform_indices = @transform_3, window_bounds = array<i64: 288, 48>}, {transform_indices = @transform_4, window_bounds = array<i64: 2, 3, 24, 24>}]} {
    %c0 = arith.constant 0 : index
    %c0_0 = arith.constant 0 : index
    %0 = vector.load %arg3[%c0, %c0_0] : memref<48x24xbf16, #tpu.memory_space<vmem>>, vector<48x24xbf16>
    %c0_1 = arith.constant 0 : index
    %c0_2 = arith.constant 0 : index
    %1 = vector.load %arg4[%c0_1, %c0_2] : memref<288x48xf32, #tpu.memory_space<vmem>>, vector<288x48xf32>
    %2 = arith.truncf %1 : vector<288x48xf32> to vector<288x48xbf16>
    %cst = arith.constant dense<0.000000e+00> : vector<288x24xf32>
    %3 = tpu.matmul %2, %0, %cst {dimension_numbers = #tpu.dot_dimension_numbers<[1], [0], [0], [1], [0, 0, 1, 1], [], []>} : vector<288x48xbf16>, vector<48x24xbf16>, vector<288x24xf32> -> vector<288x24xf32>
    %4 = arith.truncf %3 : vector<288x24xf32> to vector<288x24xbf16>
    %c0_3 = arith.constant 0 : index
    %c0_4 = arith.constant 0 : index
    %c0_5 = arith.constant 0 : index
    %5 = vector.load %arg2[%c0_3, %c0_4, %c0_5] : memref<3x24x48xbf16, #tpu.memory_space<vmem>>, vector<1x24x48xbf16>
    %6 = vector.shape_cast %5 : vector<1x24x48xbf16> to vector<24x48xbf16>
    %7 = vector.extract_strided_slice %4 {offsets = [0, 0], sizes = [48, 24], strides = [1, 1]} : vector<288x24xbf16> to vector<48x24xbf16>
    %cst_6 = arith.constant dense<0.000000e+00> : vector<24x24xf32>
    %8 = tpu.matmul %6, %7, %cst_6 {dimension_numbers = #tpu.dot_dimension_numbers<[1], [0], [0], [1], [0, 0, 1, 1], [], []>} : vector<24x48xbf16>, vector<48x24xbf16>, vector<24x24xf32> -> vector<24x24xf32>
    %c0_7 = arith.constant 0 : index
    %9 = memref.load %arg1[%c0_7] : memref<3xf32, #tpu.memory_space<smem>>
    %10 = vector.broadcast %9 : f32 to vector<24x24xf32>
    %11 = arith.subf %8, %10 : vector<24x24xf32>
    %c0_8 = arith.constant 0 : index
    %c0_9 = arith.constant 0 : index
    %c0_10 = arith.constant 0 : index
    %c0_11 = arith.constant 0 : index
    %12 = vector.load %arg5[%c0_8, %c0_9, %c0_10, %c0_11] : memref<2x3x24x24xf32, #tpu.memory_space<vmem>>, vector<1x1x24x24xf32>
    %13 = vector.shape_cast %12 : vector<1x1x24x24xf32> to vector<24x24xf32>
    %14 = vector.shape_cast %11 : vector<24x24xf32> to vector<1x1x24x24xf32>
    tpu.vector_store %arg5[%c0_8, %c0_9, %c0_10, %c0_11], %14 {strides = array<i32>} : memref<2x3x24x24xf32, #tpu.memory_space<vmem>>, vector<1x1x24x24xf32>,
    %c1 = arith.constant 1 : index
    %c0_12 = arith.constant 0 : index
    %c0_13 = arith.constant 0 : index
    %15 = vector.load %arg2[%c1, %c0_12, %c0_13] : memref<3x24x48xbf16, #tpu.memory_space<vmem>>, vector<1x24x48xbf16>
    %16 = vector.shape_cast %15 : vector<1x24x48xbf16> to vector<24x48xbf16>
    %17 = vector.extract_strided_slice %4 {offsets = [48, 0], sizes = [48, 24], strides = [1, 1]} : vector<288x24xbf16> to vector<48x24xbf16>
    %cst_14 = arith.constant dense<0.000000e+00> : vector<24x24xf32>
    %18 = tpu.matmul %16, %17, %cst_14 {dimension_numbers = #tpu.dot_dimension_numbers<[1], [0], [0], [1], [0, 0, 1, 1], [], []>} : vector<24x48xbf16>, vector<48x24xbf16>, vector<24x24xf32> -> vector<24x24xf32>
    %c1_15 = arith.constant 1 : index
    %19 = memref.load %arg1[%c1_15] : memref<3xf32, #tpu.memory_space<smem>>
    %20 = vector.broadcast %19 : f32 to vector<24x24xf32>
    %21 = arith.subf %18, %20 : vector<24x24xf32>
    %c0_16 = arith.constant 0 : index
    %c1_17 = arith.constant 1 : index
    %c0_18 = arith.constant 0 : index
    %c0_19 = arith.constant 0 : index
    %22 = vector.load %arg5[%c0_16, %c1_17, %c0_18, %c0_19] : memref<2x3x24x24xf32, #tpu.memory_space<vmem>>, vector<1x1x24x24xf32>
    %23 = vector.shape_cast %22 : vector<1x1x24x24xf32> to vector<24x24xf32>
    %24 = vector.shape_cast %21 : vector<24x24xf32> to vector<1x1x24x24xf32>
    tpu.vector_store %arg5[%c0_16, %c1_17, %c0_18, %c0_19], %24 {strides = array<i32>} : memref<2x3x24x24xf32, #tpu.memory_space<vmem>>, vector<1x1x24x24xf32>,
    %c2 = arith.constant 2 : index
    %c0_20 = arith.constant 0 : index
    %c0_21 = arith.constant 0 : index
    %25 = vector.load %arg2[%c2, %c0_20, %c0_21] : memref<3x24x48xbf16, #tpu.memory_space<vmem>>, vector<1x24x48xbf16>
    %26 = vector.shape_cast %25 : vector<1x24x48xbf16> to vector<24x48xbf16>
    %27 = vector.extract_strided_slice %4 {offsets = [96, 0], sizes = [48, 24], strides = [1, 1]} : vector<288x24xbf16> to vector<48x24xbf16>
    %cst_22 = arith.constant dense<0.000000e+00> : vector<24x24xf32>
    %28 = tpu.matmul %26, %27, %cst_22 {dimension_numbers = #tpu.dot_dimension_numbers<[1], [0], [0], [1], [0, 0, 1, 1], [], []>} : vector<24x48xbf16>, vector<48x24xbf16>, vector<24x24xf32> -> vector<24x24xf32>
    %c2_23 = arith.constant 2 : index
    %29 = memref.load %arg1[%c2_23] : memref<3xf32, #tpu.memory_space<smem>>
    %30 = vector.broadcast %29 : f32 to vector<24x24xf32>
    %31 = arith.subf %28, %30 : vector<24x24xf32>
    %c0_24 = arith.constant 0 : index
    %c2_25 = arith.constant 2 : index
    %c0_26 = arith.constant 0 : index
    %c0_27 = arith.constant 0 : index
    %32 = vector.load %arg5[%c0_24, %c2_25, %c0_26, %c0_27] : memref<2x3x24x24xf32, #tpu.memory_space<vmem>>, vector<1x1x24x24xf32>
    %33 = vector.shape_cast %32 : vector<1x1x24x24xf32> to vector<24x24xf32>
    %34 = vector.shape_cast %31 : vector<24x24xf32> to vector<1x1x24x24xf32>
    tpu.vector_store %arg5[%c0_24, %c2_25, %c0_26, %c0_27], %34 {strides = array<i32>} : memref<2x3x24x24xf32, #tpu.memory_space<vmem>>, vector<1x1x24x24xf32>,
    %c0_28 = arith.constant 0 : index
    %c0_29 = arith.constant 0 : index
    %c0_30 = arith.constant 0 : index
    %35 = vector.load %arg2[%c0_28, %c0_29, %c0_30] : memref<3x24x48xbf16, #tpu.memory_space<vmem>>, vector<1x24x48xbf16>
    %36 = vector.shape_cast %35 : vector<1x24x48xbf16> to vector<24x48xbf16>
    %37 = vector.extract_strided_slice %4 {offsets = [144, 0], sizes = [48, 24], strides = [1, 1]} : vector<288x24xbf16> to vector<48x24xbf16>
    %cst_31 = arith.constant dense<0.000000e+00> : vector<24x24xf32>
    %38 = tpu.matmul %36, %37, %cst_31 {dimension_numbers = #tpu.dot_dimension_numbers<[1], [0], [0], [1], [0, 0, 1, 1], [], []>} : vector<24x48xbf16>, vector<48x24xbf16>, vector<24x24xf32> -> vector<24x24xf32>
    %c0_32 = arith.constant 0 : index
    %39 = memref.load %arg1[%c0_32] : memref<3xf32, #tpu.memory_space<smem>>
    %40 = vector.broadcast %39 : f32 to vector<24x24xf32>
    %41 = arith.subf %38, %40 : vector<24x24xf32>
    %c1_33 = arith.constant 1 : index
    %c0_34 = arith.constant 0 : index
    %c0_35 = arith.constant 0 : index
    %c0_36 = arith.constant 0 : index
    %42 = vector.load %arg5[%c1_33, %c0_34, %c0_35, %c0_36] : memref<2x3x24x24xf32, #tpu.memory_space<vmem>>, vector<1x1x24x24xf32>
    %43 = vector.shape_cast %42 : vector<1x1x24x24xf32> to vector<24x24xf32>
    %44 = vector.shape_cast %41 : vector<24x24xf32> to vector<1x1x24x24xf32>
    tpu.vector_store %arg5[%c1_33, %c0_34, %c0_35, %c0_36], %44 {strides = array<i32>} : memref<2x3x24x24xf32, #tpu.memory_space<vmem>>, vector<1x1x24x24xf32>,
    %c1_37 = arith.constant 1 : index
    %c0_38 = arith.constant 0 : index
    %c0_39 = arith.constant 0 : index
    %45 = vector.load %arg2[%c1_37, %c0_38, %c0_39] : memref<3x24x48xbf16, #tpu.memory_space<vmem>>, vector<1x24x48xbf16>
    %46 = vector.shape_cast %45 : vector<1x24x48xbf16> to vector<24x48xbf16>
    %47 = vector.extract_strided_slice %4 {offsets = [192, 0], sizes = [48, 24], strides = [1, 1]} : vector<288x24xbf16> to vector<48x24xbf16>
    %cst_40 = arith.constant dense<0.000000e+00> : vector<24x24xf32>
    %48 = tpu.matmul %46, %47, %cst_40 {dimension_numbers = #tpu.dot_dimension_numbers<[1], [0], [0], [1], [0, 0, 1, 1], [], []>} : vector<24x48xbf16>, vector<48x24xbf16>, vector<24x24xf32> -> vector<24x24xf32>
    %c1_41 = arith.constant 1 : index
    %49 = memref.load %arg1[%c1_41] : memref<3xf32, #tpu.memory_space<smem>>
    %50 = vector.broadcast %49 : f32 to vector<24x24xf32>
    %51 = arith.subf %48, %50 : vector<24x24xf32>
    %c1_42 = arith.constant 1 : index
    %c1_43 = arith.constant 1 : index
    %c0_44 = arith.constant 0 : index
    %c0_45 = arith.constant 0 : index
    %52 = vector.load %arg5[%c1_42, %c1_43, %c0_44, %c0_45] : memref<2x3x24x24xf32, #tpu.memory_space<vmem>>, vector<1x1x24x24xf32>
    %53 = vector.shape_cast %52 : vector<1x1x24x24xf32> to vector<24x24xf32>
    %54 = vector.shape_cast %51 : vector<24x24xf32> to vector<1x1x24x24xf32>
    tpu.vector_store %arg5[%c1_42, %c1_43, %c0_44, %c0_45], %54 {strides = array<i32>} : memref<2x3x24x24xf32, #tpu.memory_space<vmem>>, vector<1x1x24x24xf32>,
    %c2_46 = arith.constant 2 : index
    %c0_47 = arith.constant 0 : index
    %c0_48 = arith.constant 0 : index
    %55 = vector.load %arg2[%c2_46, %c0_47, %c0_48] : memref<3x24x48xbf16, #tpu.memory_space<vmem>>, vector<1x24x48xbf16>
    %56 = vector.shape_cast %55 : vector<1x24x48xbf16> to vector<24x48xbf16>
    %57 = vector.extract_strided_slice %4 {offsets = [240, 0], sizes = [48, 24], strides = [1, 1]} : vector<288x24xbf16> to vector<48x24xbf16>
    %cst_49 = arith.constant dense<0.000000e+00> : vector<24x24xf32>
    %58 = tpu.matmul %56, %57, %cst_49 {dimension_numbers = #tpu.dot_dimension_numbers<[1], [0], [0], [1], [0, 0, 1, 1], [], []>} : vector<24x48xbf16>, vector<48x24xbf16>, vector<24x24xf32> -> vector<24x24xf32>
    %c2_50 = arith.constant 2 : index
    %59 = memref.load %arg1[%c2_50] : memref<3xf32, #tpu.memory_space<smem>>
    %60 = vector.broadcast %59 : f32 to vector<24x24xf32>
    %61 = arith.subf %58, %60 : vector<24x24xf32>
    %c1_51 = arith.constant 1 : index
    %c2_52 = arith.constant 2 : index
    %c0_53 = arith.constant 0 : index
    %c0_54 = arith.constant 0 : index
    %62 = vector.load %arg5[%c1_51, %c2_52, %c0_53, %c0_54] : memref<2x3x24x24xf32, #tpu.memory_space<vmem>>, vector<1x1x24x24xf32>
    %63 = vector.shape_cast %62 : vector<1x1x24x24xf32> to vector<24x24xf32>
    %64 = vector.shape_cast %61 : vector<24x24xf32> to vector<1x1x24x24xf32>
    tpu.vector_store %arg5[%c1_51, %c2_52, %c0_53, %c0_54], %64 {strides = array<i32>} : memref<2x3x24x24xf32, #tpu.memory_space<vmem>>, vector<1x1x24x24xf32>,
    return
  }
  func.func @transform_0(%arg0: i32) -> i32 {
    %c0_i32 = arith.constant 0 : i32
    %c0_i32_0 = arith.constant 0 : i32
    return %c0_i32 : i32
  }
  func.func @transform_1(%arg0: i32) -> (i32, i32, i32) {
    %c0_i32 = arith.constant 0 : i32
    %c0_i32_0 = arith.constant 0 : i32
    %c0_i32_1 = arith.constant 0 : i32
    %c0_i32_2 = arith.constant 0 : i32
    return %c0_i32, %c0_i32_0, %c0_i32_1 : i32, i32, i32
  }
  func.func @transform_2(%arg0: i32) -> (i32, i32) {
    %c0_i32 = arith.constant 0 : i32
    %c0_i32_0 = arith.constant 0 : i32
    %c0_i32_1 = arith.constant 0 : i32
    return %c0_i32, %c0_i32_0 : i32, i32
  }
  func.func @transform_3(%arg0: i32) -> (i32, i32) {
    %c0_i32 = arith.constant 0 : i32
    %c0_i32_0 = arith.constant 0 : i32
    return %arg0, %c0_i32 : i32, i32
  }
  func.func @transform_4(%arg0: i32) -> (i32, i32, i32, i32) {
    %c0_i32 = arith.constant 0 : i32
    %c0_i32_0 = arith.constant 0 : i32
    %c0_i32_1 = arith.constant 0 : i32
    %c0_i32_2 = arith.constant 0 : i32
    return %arg0, %c0_i32, %c0_i32_0, %c0_i32_1 : i32, i32, i32, i32
  }
}

</mosaic_0001>

<bundles_post_ra>
// kernel: tpu_custom_call.1
= control target key start
LH: loop header
LB: loop body
LE: loop exit
PB: predicated region body
PF: predicated region fallthrough
CT: control target
= control target key end

     0   :  { %9 = vsyncpa [#allocation4], 0  ;;  %s1499_s0 = inlined_call_operand.vmem [shape: f32[3], index: 0, kind: input, shape index: {}]   ;;  %s1500_s1 = inlined_call_operand.vmem [shape: bf16[3,24,48], index: 1, kind: input, shape index: {}]   ;;  %s1501_s2 = inlined_call_operand.vmem [shape: bf16[48,24], index: 2, kind: input, shape index: {}]   ;;  %s1502_s3 = inlined_call_operand.vmem [shape: f32[576,48], index: 3, kind: input, shape index: {}]   ;;  %s1503_s4 = inlined_call_operand.hbm [shape: f32[4,3,24,24], index: 4, kind: output, shape index: {}]  }
   0x1   :  { %10 = vsyncpa [#allocation3], 0 }
   0x2   :  { %12 = vsyncpa [#allocation3 + $0x1], 0  ;;  %s1239_s15 = smov 0   ;;  %s1241_s16 = smov 0  }
   0x3   :  { %s1243_s17 = smov 0   ;;  %s1245_s18 = smov 0  }
   0x4 LB: > { %s1260_s19 = sadd.s32 4294967295, %s1209_s18   ;;  %s947_s20 = sadd.s32 4294967294, %s1209_s18   ;;  %s1209_s18 = sphi %s1245_s18, %s1509_s18   ;;  %s1205_s17 = sphi %s1243_s17, %s1508_s17   ;;  %s1201_s16 = sphi %s1241_s16, %s1507_s16   ;;  %s1197_s15 = sphi %s1239_s15, %s1506_s15  }
   0x5   : > { %s1264_s21 = sadd.s32 1, %s1209_s18   ;;  %s114_s22 = sadd.s32 1, %s1205_s17 }
   0x6   : > { %s111_s23 = ssub.s32 %s1209_s18, %s1264_s21  ;;  %p124_p0 = scmp.ne.s32.totalorder %s1205_s17, %s1201_s16 }
   0x7   : > { %p112_p1 = scmp.eq.s32.totalorder %s111_s23, 0  ;;  %p125_p2 = scmp.eq.s32.totalorder %s1260_s19, 1 }
   0x8   : > { %p130_p3 = scmp.ne.s32.totalorder %s1201_s16, %s1197_s15  ;;  %p131_p4 = scmp.eq.s32.totalorder %s947_s20, 1 }
   0x9   : > { %s1275_s24 = scalar_select %p112_p1, %s1205_s17, %s114_s22  }
   0xa   : > { %p1277_p5 = por %p125_p2, %p124_p0  ;;  %p1281_p6 = por %p131_p4, %p130_p3 }
   0xb   : > { %p948_p7 = scmp.ge.s32.totalorder %s1209_s18, 1  ;;  %p138_p8 = scmp.lt.s32.totalorder %s1209_s18, 3 }
   0xc   : > { %p1090_p9 = scmp.eq.s32.totalorder %s1260_s19, 0  ;;  %s150_s29 = sshll.u32 %s1499_s0, 4  ;;  %s151_s29 = int_to_ptr.vmem [resolvable:$true] %s150_s29 }
   0xd   : > { %p139_p10 = pnand %p948_p7, %p138_p8  ;;  %s1211_s30 = smov [#allocation2]  }
   0xf   : > { %p1082_p11 = pneg %p139_p10  ;;  %178 = sbr.rel (%p139_p10) target bundleno = 482 (0x1e2), region = 36 }
  0x11   : > { %p1083_p12 = pnand %p1090_p9, %p1082_p11 }
  0x13   : > { %1085 = dma.vmem_to_smem (!%p1083_p12), %s151_s29, 16, %s1211_s30, [#allocation4]  }
  0x14   : > { %1188 = dma.done.wait (%p1090_p9), [#allocation4], 16  }
  0x15   : > { %1190 = vsyncadd (%p1090_p9), [#allocation4], 4294967280 }
  0x16   : > { %185 = sfence }
  0x17   : > { %v1058_v0 = vld [vmem:[%s1501_s2 + $0x10] sm:$0xff]  ;;  %s206_s7 = smul.u32 36, %s1260_s19  ;;  %v1057_v1 = vld [vmem:[%s1501_s2 + $0x8] sm:$0xff]  ;;  %v1056_v2 = vld [vmem:[%s1501_s2] sm:$0xff]  ;;  %vm292_vm0 = vcmask 392192   ;;  %s535_s6 = sld [smem:[#allocation2]] }
  0x18   : > { %352 = vmatpush.bf16.msra.mxu0 %v1058_v0  ;;  %1065 = vmatpush.bf16.msra.mxu1 %v1058_v0  ;;  %vm540_vm1 = vcmask 195584   ;;  %s999_s9 = sld [smem:[#allocation2 + $0x1]]  ;;  %s1163_s5 = scalar_lea.hbm %s1503_s4, 288 }
  0x19   : > { %p207_p13 = scmp.lt.s32.totalorder %s206_s7, 71  ;;  %1066 = vmatpush.bf16.msra.mxu2 %v1058_v0  ;;  %1067 = vmatpush.bf16.msra.mxu3 %v1058_v0  ;;  %s1012_s11 = sld [smem:[#allocation2 + $0x2]] }
  0x1b   : > { %s1511_s7 = smov (!%p207_p13, %s206_s7), 71 }
  0x1c   : > { %353 = vmatpush.bf16.msra.mxu0 %v1057_v1  ;;  %s953_s12 = sshll.u32 %s1511_s7, 3  ;;  %1068 = vmatpush.bf16.msra.mxu1 %v1057_v1  ;;  %s203_s7 = sand.u32 1, %s1201_s16  }
  0x1d   : > { %s1304_s20 = scalar_lea.vmem %s1502_s3, %s953_s12  ;;  %1069 = vmatpush.bf16.msra.mxu2 %v1057_v1  ;;  %1070 = vmatpush.bf16.msra.mxu3 %v1057_v1  ;;  %s1074_s8 = smul.u32 144, %s203_s7 }
  0x1e   : > { %v220_v3 = vld [vmem:[%s1304_s20] sm:$0xff]  ;;  %v221_v4 = vld [vmem:[%s1304_s20 + $0x8] sm:$0xff]  ;;  %v222_v6 = vld [vmem:[%s1304_s20 + $0x10] sm:$0xff]  ;;  %s1075_s12 = smul.u32 144, %s1260_s19  ;;  %s857_s27 = scalar_lea.sflag [#allocation3], %s203_s7 }
  0x1f   : > { %v256_v5 = vpack.c.bf16 %v221_v4, %v220_v3  ;;  %v223_v7 = vld [vmem:[%s1304_s20 + $0x18] sm:$0xff]  ;;  %v236_v9 = vld [vmem:[%s1304_s20 + $0x80] sm:$0xff]  ;;  %v237_v10 = vld [vmem:[%s1304_s20 + $0x88] sm:$0xff]  ;;  %s1427_s10 = scalar_lea.vmem [#allocation5], %s1074_s8 }
  0x20   : > { %354 = vmatpush.bf16.msra.mxu0 %v1056_v2  ;;  %1071 = vmatpush.bf16.msra.mxu1 %v1056_v2  ;;  %v257_v8 = vpack.c.bf16 %v223_v7, %v222_v6  ;;  %v264_v11 = vpack.c.bf16 %v237_v10, %v236_v9  ;;  %v244_v12 = vld [vmem:[%s1304_s20 + $0xc0] sm:$0xff]  ;;  %v245_v13 = vld [vmem:[%s1304_s20 + $0xc8] sm:$0xff]  ;;  %v238_v18 = vld [vmem:[%s1304_s20 + $0x90] sm:$0xff]  ;;  %s870_s22 = sshll.u32 %s1427_s10, 4  ;;  %s871_s22 = int_to_ptr.vmem [resolvable:$true] %s870_s22 }
  0x21   : > { %1072 = vmatpush.bf16.msra.mxu2 %v1056_v2  ;;  %1073 = vmatpush.bf16.msra.mxu3 %v1056_v2  ;;  %v268_v14 = vpack.c.bf16 %v245_v13, %v244_v12  ;;  %v224_v15 = vld [vmem:[%s1304_s20 + $0x20] sm:$0xff]  ;;  %v225_v16 = vld [vmem:[%s1304_s20 + $0x28] sm:$0xff]  ;;  %v239_v19 = vld [vmem:[%s1304_s20 + $0x98] sm:$0xff] }
  0x22   : > { %v258_v17 = vpack.c.bf16 %v225_v16, %v224_v15  ;;  %v265_v20 = vpack.c.bf16 %v239_v19, %v238_v18  ;;  %v246_v21 = vld [vmem:[%s1304_s20 + $0xd0] sm:$0xff]  ;;  %v247_v22 = vld [vmem:[%s1304_s20 + $0xd8] sm:$0xff]  ;;  %v240_v27 = vld [vmem:[%s1304_s20 + $0xa0] sm:$0xff] }
  0x23   : > { %966 = vmatmul.msk.bf16.vlgmr.msra.gmra.mxu0 %vm292_vm0, %v256_v5  ;;  %974 = vmatmul.msk.bf16.vlgmr.msra.gmra.mxu1 %vm292_vm0, %v264_v11  ;;  %v269_v23 = vpack.c.bf16 %v247_v22, %v246_v21  ;;  %v226_v24 = vld [vmem:[%s1304_s20 + $0x30] sm:$0xff]  ;;  %v227_v25 = vld [vmem:[%s1304_s20 + $0x38] sm:$0xff]  ;;  %v241_v28 = vld [vmem:[%s1304_s20 + $0xa8] sm:$0xff] }
  0x24   : > { %978 = vmatmul.msk.bf16.vlgmr.msra.gmra.mxu2 %vm292_vm0, %v268_v14  ;;  %v259_v26 = vpack.c.bf16 %v227_v25, %v226_v24  ;;  %v266_v29 = vpack.c.bf16 %v241_v28, %v240_v27  ;;  %v248_v30 = vld [vmem:[%s1304_s20 + $0xe0] sm:$0xff]  ;;  %v249_v31 = vld [vmem:[%s1304_s20 + $0xe8] sm:$0xff]  ;;  %v242_v39 = vld [vmem:[%s1304_s20 + $0xb0] sm:$0xff] }
  0x25   : > { %v252_v32 = vld [vmem:[%s1304_s20 + $0x100] sm:$0xff]  ;;  %v270_v33 = vpack.c.bf16 %v249_v31, %v248_v30  ;;  %v253_v34 = vld [vmem:[%s1304_s20 + $0x108] sm:$0xff]  ;;  %v243_v40 = vld [vmem:[%s1304_s20 + $0xb8] sm:$0xff] }
  0x26   : > { %v272_v35 = vpack.c.bf16 %v253_v34, %v252_v32  ;;  %v228_v36 = vld [vmem:[%s1304_s20 + $0x40] sm:$0xff]  ;;  %v229_v37 = vld [vmem:[%s1304_s20 + $0x48] sm:$0xff]  ;;  %v267_v41 = vpack.c.bf16 %v243_v40, %v242_v39  ;;  %v254_v42 = vld [vmem:[%s1304_s20 + $0x110] sm:$0xff] }
  0x27   : > { %v260_v38 = vpack.c.bf16 %v229_v37, %v228_v36  ;;  %v255_v43 = vld [vmem:[%s1304_s20 + $0x118] sm:$0xff]  ;;  %v230_v45 = vld [vmem:[%s1304_s20 + $0x50] sm:$0xff]  ;;  %v232_v48 = vld [vmem:[%s1304_s20 + $0x60] sm:$0xff] }
  0x28   : > { %982 = vmatmul.msk.bf16.vlgmr.msra.gmra.mxu3 %vm292_vm0, %v272_v35  ;;  %v273_v44 = vpack.c.bf16 %v255_v43, %v254_v42  ;;  %v231_v46 = vld [vmem:[%s1304_s20 + $0x58] sm:$0xff]  ;;  %v233_v49 = vld [vmem:[%s1304_s20 + $0x68] sm:$0xff]  ;;  %v250_v51 = vld [vmem:[%s1304_s20 + $0xf0] sm:$0xff] }
  0x29   : > { %v261_v47 = vpack.c.bf16 %v231_v46, %v230_v45  ;;  %v262_v50 = vpack.c.bf16 %v233_v49, %v232_v48  ;;  %v251_v52 = vld [vmem:[%s1304_s20 + $0xf8] sm:$0xff]  ;;  %v234_v54 = vld [vmem:[%s1304_s20 + $0x70] sm:$0xff] }
  0x2a   : > { %v271_v53 = vpack.c.bf16 %v251_v52, %v250_v51  ;;  %v235_v55 = vld [vmem:[%s1304_s20 + $0x78] sm:$0xff]  ;;  %s869_s20 = scalar_lea.hbm %s1503_s4, %s1075_s12 }
  0x2b   : > { %v263_v56 = vpack.c.bf16 %v235_v55, %v234_v54  ;;  %s872_s23 = sshll.u32 %s869_s20, 4  ;;  %s873_s23 = int_to_ptr.hbm [resolvable:$true] %s872_s23 }
  0x2c   : > { %s1157_s19 = sshra.s32 %s873_s23, 4  ;;  %s1158_s19 = int_to_ptr.hbm [resolvable:$true] %s1157_s19 }
  0x2d   : > { %s1159_s28 = scalar_lea.hbm %s1158_s19, 144  ;;  %p1164_p3 = scmp.lt.s32.totalorder %s1158_s19, %s1503_s4 }
  0x2e   : > { %p1160_p0 = scmp.ne.s32.totalorder %s1158_s19, %s1159_s28  ;;  %p1165_p4 = scmp.lt.s32.totalorder %s1163_s5, %s1159_s28 }
  0x30   : > { %p1161_p1 = pnand %p1160_p0, %p1277_p5  ;;  %p1166_p7 = por %p1165_p4, %p1164_p3 }
  0x32   : > { %p1162_p2 = pneg %p1161_p1 }
  0x33   : > { %967 = vmatmul.msk.bf16.gmra.mxu0 %vm292_vm0, %v257_v8  ;;  %975 = vmatmul.msk.bf16.gmra.mxu1 %vm292_vm0, %v265_v20 }
  0x34   : > { %979 = vmatmul.msk.bf16.gmra.mxu2 %vm292_vm0, %v269_v23  ;;  %p1167_p8 = pnand %p1166_p7, %p1162_p2 }
  0x38   : > { %983 = vmatmul.msk.bf16.gmra.mxu3 %vm292_vm0, %v273_v44 }
  0x43   : > { %968 = vmatmul.msk.bf16.gmra.mxu0 %vm292_vm0, %v258_v17  ;;  %976 = vmatmul.msk.bf16.gmra.mxu1 %vm292_vm0, %v266_v29 }
  0x44   : > { %980 = vmatmul.msk.bf16.gmra.mxu2 %vm292_vm0, %v270_v33 }
  0x53   : > { %969 = vmatmul.msk.bf16.gmra.mxu0 %vm292_vm0, %v259_v26  ;;  %977 = vmatmul.msk.bf16.gmra.mxu1 %vm292_vm0, %v267_v41 }
  0x54   : > { %981 = vmatmul.msk.bf16.gmra.mxu2 %vm292_vm0, %v271_v53 }
  0x63   : > { %970 = vmatmul.msk.bf16.gmra.mxu0 %vm292_vm0, %v260_v38 }
  0x73   : > { %971 = vmatmul.msk.bf16.gmra.mxu0 %vm292_vm0, %v261_v47 }
  0x83   : > { %972 = vmatmul.msk.bf16.gmra.mxu0 %vm292_vm0, %v262_v50 }
  0x93   : > { %973 = vmatmul.msk.bf16.gmra.mxu0 %vm292_vm0, %v263_v56 }
  0xa0   : > { %v356_v57 = vpop.f32.mrf.mxu0  ;;  %v396_v60 = vpop.f32.mrf.mxu1 }
  0xa1   : > { %v446_v13 = vpack.c.bf16 %v356_v57, %v356_v57  ;;  %v462_v25 = vpack.c.bf16 %v396_v60, %v396_v60 }
  0xa3   : > { %v499_v20 = vunpack.c.l.b16 %v446_v13  ;;  %v629_v29 = vunpack.c.l.b16 %v462_v25  ;;  %v1059_v13 = vld [vmem:[%s1500_s1] sm:$0xff] }
  0xa7   : > { %v1360_v2 = vpop.f32.mrf.mxu2 }
  0xa8   : > { %v358_v58 = vpop.f32.mrf.mxu0  ;;  %v398_v62 = vpop.f32.mrf.mxu1 }
  0xa9   : > { %v447_v10 = vpack.c.bf16 %v358_v58, %v358_v58  ;;  %v463_v26 = vpack.c.bf16 %v398_v62, %v398_v62 }
  0xab   : > { %v500_v16 = vunpack.c.l.b16 %v447_v10  ;;  %v630_v30 = vunpack.c.l.b16 %v463_v26  ;;  %v1366_v53 = vpop.f32.mrf.mxu3 }
  0xad   : > { %v505_v21 = vpack.c.b16 %v500_v16, %v499_v20  ;;  %v633_v33 = vpack.c.b16 %v630_v30, %v629_v29  ;;  %v470_v20 = vpack.c.bf16 %v1360_v2, %v1360_v2  ;;  %v992_v2 = vld [vmem:[%s1500_s1 + $0x14] sm:$0xf] }
  0xaf   : > { %v1364_v18 = vpop.f32.mrf.mxu2  ;;  %648 = vmatpush.bf16.msrb.mxu3 %v633_v33  ;;  %v749_v25 = vunpack.c.l.b16 %v470_v20 }
  0xb0   : > { %v361_v59 = vpop.f32.mrf.mxu0  ;;  %v401_v0 = vpop.f32.mrf.mxu1 }
  0xb1   : > { %v448_v7 = vpack.c.bf16 %v361_v59, %v361_v59  ;;  %v464_v40 = vpack.c.bf16 %v401_v0, %v401_v0 }
  0xb3   : > { %v501_v14 = vunpack.c.l.b16 %v448_v7  ;;  %v687_v48 = vunpack.c.l.b16 %v464_v40 }
  0xb7   : > { %v421_v24 = vpop.f32.mrf.mxu2 }
  0xb8   : > { %v363_v61 = vpop.f32.mrf.mxu0  ;;  %v403_v6 = vpop.f32.mrf.mxu1 }
  0xb9   : > { %v449_v4 = vpack.c.bf16 %v363_v61, %v363_v61  ;;  %v465_v41 = vpack.c.bf16 %v403_v6, %v403_v6 }
  0xbb   : > { %v502_v11 = vunpack.c.l.b16 %v449_v4  ;;  %v688_v49 = vunpack.c.l.b16 %v465_v41 }
  0xbd   : > { %v506_v17 = vpack.c.b16 %v502_v11, %v501_v14  ;;  %v693_v51 = vpack.c.b16 %v688_v49, %v687_v48 }
  0xbf   : > { %v423_v31 = vpop.f32.mrf.mxu2 }
  0xc0   : > { %v366_v63 = vpop.f32.mrf.mxu0  ;;  %v406_v19 = vpop.f32.mrf.mxu1  ;;  %v473_v6 = vpack.c.bf16 %v423_v31, %v423_v31  ;;  %v553_v31 = vunpack.c.l.b16 %v992_v2 }
  0xc1   : > { %v450_v1 = vpack.c.bf16 %v366_v63, %v366_v63  ;;  %v466_v35 = vpack.c.bf16 %v406_v19, %v406_v19 }
  0xc3   : > { %v503_v8 = vunpack.c.l.b16 %v450_v1  ;;  %v689_v42 = vunpack.c.l.b16 %v466_v35  ;;  %v555_v35 = vpack.c.b16 %v553_v31, %v553_v31 }
  0xc7   : > { %v426_v45 = vpop.f32.mrf.mxu2 }
  0xc8   : > { %v368_v3 = vpop.f32.mrf.mxu0  ;;  %v408_v23 = vpop.f32.mrf.mxu1  ;;  %v474_v61 = vpack.c.bf16 %v426_v45, %v426_v45 }
  0xc9   : > { %v451_v5 = vpack.c.bf16 %v368_v3, %v368_v3  ;;  %v467_v36 = vpack.c.bf16 %v408_v23, %v408_v23 }
  0xcb   : > { %v504_v9 = vunpack.c.l.b16 %v451_v5  ;;  %v690_v43 = vunpack.c.l.b16 %v467_v36  ;;  %v472_v5 = vpack.c.bf16 %v421_v24, %v421_v24 }
  0xcd   : > { %v507_v12 = vpack.c.b16 %v504_v9, %v503_v8  ;;  %v694_v50 = vpack.c.b16 %v690_v43, %v689_v42  ;;  %v753_v8 = vunpack.c.l.b16 %v474_v61  ;;  %v751_v16 = vunpack.c.l.b16 %v472_v5  ;;  %v1062_v61 = vld [vmem:[%s1500_s1] sm:$0xff]  ;;  %v1027_v5 = vld [vmem:[%s1500_s1 + $0x14] sm:$0xf] }
  0xcf   : > { %522 = vmatpush.bf16.msrb.mxu1 %v507_v12  ;;  %v428_v57 = vpop.f32.mrf.mxu2  ;;  %v438_v12 = vpop.f32.mrf.mxu3 }
  0xd0   : > { %v1362_v15 = vpop.f32.mrf.mxu0  ;;  %v411_v28 = vpop.f32.mrf.mxu1  ;;  %v475_v62 = vpack.c.bf16 %v428_v57, %v428_v57 }
  0xd1   : > { %v468_v32 = vpack.c.bf16 %v411_v28, %v411_v28  ;;  %v452_v3 = vpack.c.bf16 %v1362_v15, %v1362_v15 }
  0xd2   : > { %v754_v9 = vunpack.c.l.b16 %v475_v62 }
  0xd3   : > { %523 = vmatpush.bf16.msrb.mxu1 %v506_v17  ;;  %v691_v38 = vunpack.c.l.b16 %v468_v32  ;;  %v562_v14 = vunpack.c.l.b16 %v452_v3  ;;  %v752_v17 = vunpack.c.l.b16 %v473_v6  ;;  %v1005_v3 = vld [vmem:[%s1500_s1 + $0x20] sm:$0xf]  ;;  %v672_v6 = vld [vmem:[%s1500_s1 + $0x8] sm:$0xf] }
  0xd4   : > { %v757_v19 = vpack.c.b16 %v754_v9, %v753_v8  ;;  %v740_v9 = vunpack.c.l.b16 %v1027_v5 }
  0xd5   : > { %v756_v23 = vpack.c.b16 %v752_v17, %v751_v16  ;;  %v536_v17 = vstv %s535_s6 }
  0xd7   : > { %524 = vmatpush.bf16.msrb.mxu1 %v505_v21  ;;  %v471_v21 = vpack.c.bf16 %v1364_v18, %v1364_v18  ;;  %v484_v18 = vld [vmem:[%s1500_s1 + $0x8] sm:$0xf]  ;;  %v431_v33 = vpop.f32.mrf.mxu2 }
  0xd8   : > { %v373_v22 = vpop.f32.mrf.mxu0  ;;  %v413_v37 = vpop.f32.mrf.mxu1  ;;  %v490_v30 = vunpack.c.l.b16 %v484_v18 }
  0xd9   : > { %v469_v39 = vpack.c.bf16 %v413_v37, %v413_v37  ;;  %v453_v63 = vpack.c.bf16 %v373_v22, %v373_v22  ;;  %v1060_v22 = vld [vmem:[%s1500_s1 + $0xc] sm:$0xff]  ;;  %v750_v26 = vunpack.c.l.b16 %v471_v21 }
  0xda   : > { %988 = vmatmul.msk.bf16.vlgmr.msrb.gmra.mxu1 %vm292_vm0, %v1059_v13  ;;  %v492_v32 = vpack.c.b16 %v490_v30, %v490_v30  ;;  %v1040_v13 = vld [vmem:[%s1500_s1 + $0x20] sm:$0xf] }
  0xdb   : > { %v692_v44 = vunpack.c.l.b16 %v469_v39  ;;  %v563_v10 = vunpack.c.l.b16 %v453_v63  ;;  %v755_v28 = vpack.c.b16 %v750_v26, %v749_v25 }
  0xdd   : > { %v695_v46 = vpack.c.b16 %v692_v44, %v691_v38  ;;  %v568_v15 = vpack.c.b16 %v563_v10, %v562_v14  ;;  %v802_v14 = vunpack.c.l.b16 %v1040_v13 }
  0xdf   : > { %710 = vmatpush.bf16.msra.mxu1 %v695_v46  ;;  %v433_v49 = vpop.f32.mrf.mxu2  ;;  %v804_v16 = vpack.c.b16 %v802_v14, %v802_v14 }
  0xe0   : > { %v376_v27 = vpop.f32.mrf.mxu0 }
  0xe1   : > { %v454_v58 = vpack.c.bf16 %v376_v27, %v376_v27  ;;  %v441_v27 = vpop.f32.mrf.mxu3 }
  0xe2   : > { %v480_v37 = vpack.c.bf16 %v441_v27, %v441_v27 }
  0xe3   : > { %711 = vmatpush.bf16.msra.mxu1 %v694_v50  ;;  %v564_v4 = vunpack.c.l.b16 %v454_v58  ;;  %v478_v50 = vpack.c.bf16 %v1366_v53, %v1366_v53 }
  0xe4   : > { %v815_v45 = vunpack.c.l.b16 %v480_v37 }
  0xe5   : > { %v813_v58 = vunpack.c.l.b16 %v478_v50 }
  0xe7   : > { %712 = vmatpush.bf16.msra.mxu1 %v693_v51  ;;  %v479_v51 = vpack.c.bf16 %v438_v12, %v438_v12  ;;  %v1064_v12 = vld [vmem:[%s1500_s1 + $0x18] sm:$0xff] }
  0xe8   : > { %v378_v34 = vpop.f32.mrf.mxu0 }
  0xe9   : > { %v455_v55 = vpack.c.bf16 %v378_v34, %v378_v34  ;;  %v443_v34 = vpop.f32.mrf.mxu3 }
  0xea   : > { %989 = vmatmul.msk.bf16.gmra.mxu1 %vm292_vm0, %v492_v32  ;;  %v481_v39 = vpack.c.bf16 %v443_v34, %v443_v34 }
  0xeb   : > { %v565_v0 = vunpack.c.l.b16 %v455_v55  ;;  %v476_v55 = vpack.c.bf16 %v431_v33, %v431_v33  ;;  %v662_v33 = vstv %s1012_s11 }
  0xec   : > { %v816_v46 = vunpack.c.l.b16 %v481_v39 }
  0xed   : > { %v569_v11 = vpack.c.b16 %v565_v0, %v564_v4  ;;  %v811_v53 = vunpack.c.l.b16 %v476_v55  ;;  %v1063_v0 = vld [vmem:[%s1500_s1 + $0xc] sm:$0xff]  ;;  %v616_v4 = vunpack.c.l.b16 %v1005_v3 }
  0xef   : > { %v618_v8 = vpack.c.b16 %v616_v4, %v616_v4 }
  0xf0   : > { %v381_v47 = vpop.f32.mrf.mxu0 }
  0xf1   : > { %v456_v52 = vpack.c.bf16 %v381_v47, %v381_v47 }
  0xf3   : > { %v566_v59 = vunpack.c.l.b16 %v456_v52 }
  0xf8   : > { %v383_v54 = vpop.f32.mrf.mxu0 }
  0xf9   : > { %v457_v56 = vpack.c.bf16 %v383_v54, %v383_v54  ;;  %v819_v54 = vpack.c.b16 %v816_v46, %v815_v45 }
  0xfa   : > { %1020 = vmatmul.msk.bf16.vlgmr.msra.gmra.mxu1 %vm292_vm0, %v1062_v61 }
  0xfb   : > { %v567_v60 = vunpack.c.l.b16 %v457_v56  ;;  %v477_v56 = vpack.c.bf16 %v433_v49, %v433_v49 }
  0xfd   : > { %v570_v1 = vpack.c.b16 %v567_v60, %v566_v59  ;;  %v814_v59 = vunpack.c.l.b16 %v479_v51  ;;  %v1061_v60 = vld [vmem:[%s1500_s1 + $0x18] sm:$0xff]  ;;  %v812_v62 = vunpack.c.l.b16 %v477_v56 }
  0xff   : > { %585 = vmatpush.bf16.msrb.mxu2 %v570_v1  ;;  %v818_v63 = vpack.c.b16 %v814_v59, %v813_v58  ;;  %v817_v1 = vpack.c.b16 %v812_v62, %v811_v53 }
 0x100   : > { %v386_v7 = vpop.f32.mrf.mxu0 }
 0x101   : > { %v458_v42 = vpack.c.bf16 %v386_v7, %v386_v7  ;;  %v678_v7 = vunpack.c.l.b16 %v672_v6 }
 0x103   : > { %586 = vmatpush.bf16.msrb.mxu2 %v569_v11  ;;  %v625_v52 = vunpack.c.l.b16 %v458_v42  ;;  %v680_v10 = vpack.c.b16 %v678_v7, %v678_v7  ;;  %v742_v11 = vpack.c.b16 %v740_v9, %v740_v9 }
 0x107   : > { %587 = vmatpush.bf16.msrb.mxu2 %v568_v15 }
 0x108   : > { %v388_v24 = vpop.f32.mrf.mxu0 }
 0x109   : > { %v459_v40 = vpack.c.bf16 %v388_v24, %v388_v24 }
 0x10a   : > { %997 = vmatmul.msk.bf16.vlgmr.msrb.gmra.mxu2 %vm292_vm0, %v1060_v22  ;;  %1021 = vmatmul.msk.bf16.gmra.mxu1 %vm292_vm0, %v680_v10  ;;  %v599_v22 = vstv %s999_s9 }
 0x10b   : > { %772 = vmatpush.bf16.msra.mxu2 %v757_v19  ;;  %v626_v47 = vunpack.c.l.b16 %v459_v40 }
 0x10d   : > { %v631_v57 = vpack.c.b16 %v626_v47, %v625_v52 }
 0x10f   : > { %773 = vmatpush.bf16.msra.mxu2 %v756_v23 }
 0x110   : > { %v391_v29 = vpop.f32.mrf.mxu0 }
 0x111   : > { %v460_v36 = vpack.c.bf16 %v391_v29, %v391_v29 }
 0x113   : > { %774 = vmatpush.bf16.msra.mxu2 %v755_v28  ;;  %v627_v43 = vunpack.c.l.b16 %v460_v36 }
 0x118   : > { %v393_v38 = vpop.f32.mrf.mxu0 }
 0x119   : > { %v461_v41 = vpack.c.bf16 %v393_v38, %v393_v38 }
 0x11a   : > { %998 = vmatmul.msk.bf16.gmra.mxu2 %vm292_vm0, %v555_v35 }
 0x11b   : > { %v628_v44 = vunpack.c.l.b16 %v461_v41 }
 0x11d   : > { %v632_v48 = vpack.c.b16 %v628_v44, %v627_v43 }
 0x11f   : > { %649 = vmatpush.bf16.msrb.mxu3 %v632_v48 }
 0x123   : > { %650 = vmatpush.bf16.msrb.mxu3 %v631_v57 }
 0x126   : > { %1010 = vmatmul.msk.bf16.vlgmr.msrb.gmra.mxu3 %vm292_vm0, %v1061_v60 }
 0x127   : > { %834 = vmatpush.bf16.msra.mxu3 %v819_v54 }
 0x12a   : > { %1032 = vmatmul.msk.bf16.vlgmr.msra.gmra.mxu2 %vm292_vm0, %v1063_v0 }
 0x12b   : > { %835 = vmatpush.bf16.msra.mxu3 %v818_v63 }
 0x12f   : > { %836 = vmatpush.bf16.msra.mxu3 %v817_v1 }
 0x136   : > { %1011 = vmatmul.msk.bf16.gmra.mxu3 %vm292_vm0, %v618_v8 }
 0x13a   : > { %1033 = vmatmul.msk.bf16.gmra.mxu2 %vm292_vm0, %v742_v11 }
 0x146   : > { %1045 = vmatmul.msk.bf16.vlgmr.msra.gmra.mxu3 %vm292_vm0, %v1064_v12 }
 0x156   : > { %1046 = vmatmul.msk.bf16.gmra.mxu3 %vm292_vm0, %v804_v16 }
 0x157   : > { %v526_v19 = vpop.f32.mrf.mxu1 }
 0x158   : > { %v537_v15 = vsub.f32 %v526_v19, %v536_v17 }
 0x15a   : > { %541 = vst.msk [vmem:[%s1427_s10] sm:$0xff] %vm540_vm1, %v537_v15 }
 0x15f   : > { %v528_v20 = vpop.f32.mrf.mxu1 }
 0x160   : > { %v538_v21 = vsub.f32 %v528_v20, %v536_v17 }
 0x162   : > { %542 = vst.msk [vmem:[%s1427_s10 + $0x8] sm:$0xff] %vm540_vm1, %v538_v21 }
 0x167   : > { %v531_v25 = vpop.f32.mrf.mxu1 }
 0x168   : > { %v539_v26 = vsub.f32 %v531_v25, %v536_v17 }
 0x16a   : > { %543 = vst.msk [vmem:[%s1427_s10 + $0x10] sm:$0xff] %vm540_vm1, %v539_v26 }
 0x16f   : > { %v533_v2 = vpop.f32.mrf.mxu1 }
 0x177   : > { %v714_v30 = vpop.f32.mrf.mxu1 }
 0x178   : > { %v725_v31 = vsub.f32 %v714_v30, %v536_v17 }
 0x17a   : > { %1022 = vst.msk [vmem:[%s1427_s10 + $0x48] sm:$0xff] %vm540_vm1, %v725_v31 }
 0x17f   : > { %v716_v35 = vpop.f32.mrf.mxu1 }
 0x180   : > { %v726_v37 = vsub.f32 %v716_v35, %v536_v17 }
 0x182   : > { %1023 = vst.msk [vmem:[%s1427_s10 + $0x50] sm:$0xff] %vm540_vm1, %v726_v37 }
 0x187   : > { %v719_v41 = vpop.f32.mrf.mxu1 }
 0x188   : > { %v727_v43 = vsub.f32 %v719_v41, %v536_v17 }
 0x18a   : > { %1024 = vst.msk [vmem:[%s1427_s10 + $0x58] sm:$0xff] %vm540_vm1, %v727_v43 }
 0x18d   : > { %v589_v23 = vpop.f32.mrf.mxu2 }
 0x18e   : > { %v600_v24 = vsub.f32 %v589_v23, %v599_v22 }
 0x18f   : > { %v721_v47 = vpop.f32.mrf.mxu1 }
 0x190   : > { %1000 = vst.msk [vmem:[%s1427_s10 + $0x18] sm:$0xff] %vm540_vm1, %v600_v24 }
 0x195   : > { %v591_v27 = vpop.f32.mrf.mxu2 }
 0x196   : > { %v601_v28 = vsub.f32 %v591_v27, %v599_v22 }
 0x198   : > { %1001 = vst.msk [vmem:[%s1427_s10 + $0x20] sm:$0xff] %vm540_vm1, %v601_v28 }
 0x19d   : > { %v594_v18 = vpop.f32.mrf.mxu2 }
 0x19e   : > { %v602_v29 = vsub.f32 %v594_v18, %v599_v22 }
 0x1a0   : > { %1002 = vst.msk [vmem:[%s1427_s10 + $0x28] sm:$0xff] %vm540_vm1, %v602_v29 }
 0x1a5   : > { %v596_v32 = vpop.f32.mrf.mxu2 }
 0x1a9   : > { %v652_v34 = vpop.f32.mrf.mxu3 }
 0x1aa   : > { %v663_v36 = vsub.f32 %v652_v34, %v662_v33 }
 0x1ac   : > { %1013 = vst.msk [vmem:[%s1427_s10 + $0x30] sm:$0xff] %vm540_vm1, %v663_v36 }
 0x1ad   : > { %v776_v38 = vpop.f32.mrf.mxu2 }
 0x1ae   : > { %v787_v39 = vsub.f32 %v776_v38, %v599_v22 }
 0x1b0   : > { %1035 = vst.msk [vmem:[%s1427_s10 + $0x60] sm:$0xff] %vm540_vm1, %v787_v39 }
 0x1b1   : > { %v654_v40 = vpop.f32.mrf.mxu3 }
 0x1b2   : > { %v664_v42 = vsub.f32 %v654_v40, %v662_v33 }
 0x1b4   : > { %1014 = vst.msk [vmem:[%s1427_s10 + $0x38] sm:$0xff] %vm540_vm1, %v664_v42 }
 0x1b5   : > { %v778_v44 = vpop.f32.mrf.mxu2 }
 0x1b6   : > { %v788_v45 = vsub.f32 %v778_v44, %v599_v22 }
 0x1b8   : > { %1036 = vst.msk [vmem:[%s1427_s10 + $0x68] sm:$0xff] %vm540_vm1, %v788_v45 }
 0x1b9   : > { %v657_v46 = vpop.f32.mrf.mxu3 }
 0x1ba   : > { %v665_v48 = vsub.f32 %v657_v46, %v662_v33 }
 0x1bc   : > { %1015 = vst.msk [vmem:[%s1427_s10 + $0x40] sm:$0xff] %vm540_vm1, %v665_v48 }
 0x1bd   : > { %v781_v49 = vpop.f32.mrf.mxu2 }
 0x1be   : > { %v789_v50 = vsub.f32 %v781_v49, %v599_v22 }
 0x1c0   : > { %1037 = vst.msk [vmem:[%s1427_s10 + $0x70] sm:$0xff] %vm540_vm1, %v789_v50 }
 0x1c1   : > { %v659_v51 = vpop.f32.mrf.mxu3 }
 0x1c5   : > { %v783_v52 = vpop.f32.mrf.mxu2 }
 0x1c9   : > { %v838_v54 = vpop.f32.mrf.mxu3 }
 0x1ca   : > { %v849_v55 = vsub.f32 %v838_v54, %v662_v33 }
 0x1cc   : > { %1048 = vst.msk [vmem:[%s1427_s10 + $0x78] sm:$0xff] %vm540_vm1, %v849_v55 }
 0x1d1   : > { %v840_v56 = vpop.f32.mrf.mxu3 }
 0x1d2   : > { %v850_v57 = vsub.f32 %v840_v56, %v662_v33 }
 0x1d4   : > { %1049 = vst.msk [vmem:[%s1427_s10 + $0x80] sm:$0xff] %vm540_vm1, %v850_v57 }
 0x1d9   : > { %v843_v58 = vpop.f32.mrf.mxu3 }
 0x1da   : > { %v851_v59 = vsub.f32 %v843_v58, %v662_v33 }
 0x1dc   : > { %1050 = vst.msk [vmem:[%s1427_s10 + $0x88] sm:$0xff] %vm540_vm1, %v851_v59 }
 0x1dd   : > { %1170 = shalt.err (!%p1167_p8)
}
 0x1de   : > { %s1212_s7 = smov 128   ;;  %s1213_s9 = smov 8  }
 0x1df   : > { %1080 = dma.vmem_to_hbm [thread:$0]  (%p1277_p5), %s871_s22, 2304, %s873_s23, %s857_s27, %s1212_s7, %s1212_s7, %s1213_s9  }
 0x1e1   : > { %v845_v60 = vpop.f32.mrf.mxu3 }
 0x1e2 PF: > { %p1092_p9 = scmp.ge.s32.totalorder %s1209_s18, 2  ;;  %s887_s10 = sand.u32 1, %s1197_s15  }
 0x1e3   : > { %s888_s11 = scalar_lea.sflag [#allocation3], %s887_s10 }
 0x1e4   : > { %p1087_p10 = pnand %p1092_p9, %p1281_p6 }
 0x1e6   : > { %p1088_p11 = pneg %p1087_p10 }
 0x1e8   : > { %1192 = dma.done.wait (%p1088_p11), %s888_s11, 2304  }
 0x1e9   : > { %1194 = vsyncadd (%p1088_p11), %s888_s11, 4294964992  ;;  %p15_p12 = scmp.ge.s32.totalorder %s1264_s21, 4   ;;  %s1506_s15 = smov %s1201_s16 }
 0x1ea   : > { %s1507_s16 = smov %s1205_s17  ;;  %s1508_s17 = smov %s1275_s24 }
 0x1eb   : > { %s1509_s18 = smov %s1264_s21  ;;  %17 = sbr.rel (!%p15_p12) target bundleno = 4 (0x4), region = 83 }
 0x1f0   :  { %894 = vsyncpa [#allocation3], 1 }
 0x1f1   :  { %896 = vsyncpa [#allocation3 + $0x1], 1 }
 0x1f2   :  { %897 = vsyncpa [#allocation4], 1 }
 0x1f3   :  { %899 = vsyncpa [#allocation4 + $0x1], 1 }

</bundles_post_ra>
